<compile_context>
chip_gen: v6e
topology: v6e:2x2x1
jax: 0.10.0
libtpu: 0.0.40
codegen_flags: <defaults>
</compile_context>

<pallas_src>
import jax
import jax.numpy as jnp
from jax.experimental import pallas as pl
from jax.experimental.pallas import tpu as pltpu


def dummy_body_forward(x):
    """DummyBody.forward == identity.  No kernel launched (recommended path)."""
    return x


def _make_hbm_copy_kernel(chunk_bounds):
    """Build an HBM->HBM DMA copy kernel.

    chunk_bounds: None for a single whole-ref DMA, or a static list of
    (start, size) slices along dim 0 (all DMAs started, then all waited).
    """

    def kernel(x_hbm, o_hbm, sem):
        if chunk_bounds is None:
            cp = pltpu.make_async_copy(x_hbm, o_hbm, sem.at[0])
            cp.start()
            cp.wait()
        else:
            copies = []
            for c, (start, size) in enumerate(chunk_bounds):
                cp = pltpu.make_async_copy(
                    x_hbm.at[pl.ds(start, size)],
                    o_hbm.at[pl.ds(start, size)],
                    sem.at[c],
                )
                cp.start()
                copies.append(cp)
            for cp in copies:
                cp.wait()

    return kernel


def dummy_body_forward_pallas(x, *, max_chunks=4, chunk_threshold_bytes=4 << 20):
    """Identity forward as an explicit Pallas HBM->HBM DMA copy.

    Only use this when an independent materialized copy of x is genuinely
    required; otherwise use dummy_body_forward (plain identity).
    """
    n_bytes = x.size * x.dtype.itemsize

    # Chunking plan (static, computed in Python).  A single DMA already runs
    # at the HBM roofline; a few chunks merely overlap DMA issue for large
    # arrays and split issue work across queues.  Small inputs use one DMA.
    chunk_bounds = None
    nchunks = 1
    if (
        x.ndim >= 2
        and x.shape[0] >= 2
        and max_chunks >= 2
        and n_bytes >= chunk_threshold_bytes
    ):
        rows = x.shape[0]
        want = min(max_chunks, rows)
        if x.ndim == 2:
            # dim 0 is the sublane dim: keep chunk starts 8-aligned so the
            # DMA slices stay tile-aligned (last chunk runs to the end).
            base = (rows // want) // 8 * 8
            if base > 0:
                sizes = [base] * want
                sizes[-1] = rows - base * (want - 1)
                chunk_bounds, start = [], 0
                for s in sizes:
                    chunk_bounds.append((start, s))
                    start += s
                nchunks = want
        else:
            # dim 0 is not part of the (8,128) tiled dims: any split is clean.
            base = rows // want
            rem = rows % want
            chunk_bounds, start = [], 0
            for c in range(want):
                s = base + (1 if c < rem else 0)
                chunk_bounds.append((start, s))
                start += s
            nchunks = want

    cost = pl.CostEstimate(
        flops=0,
        transcendentals=0,
        bytes_accessed=2 * n_bytes,
    )

    return pl.pallas_call(
        _make_hbm_copy_kernel(chunk_bounds),
        out_shape=jax.ShapeDtypeStruct(x.shape, x.dtype),
        in_specs=[pl.BlockSpec(memory_space=pl.ANY)],
        out_specs=pl.BlockSpec(memory_space=pl.ANY),
        scratch_shapes=[pltpu.SemaphoreType.DMA((nchunks,))],
        cost_estimate=cost,
    )(x)


if __name__ == "__main__":
    key = jax.random.PRNGKey(0)
    k1, k2, k3 = jax.random.split(key, 3)

    # DummyBody(state_dim=32); small batch.
    batch, state_dim = 8, 32
    x = jax.random.normal(k1, (batch, state_dim), dtype=jnp.float32)

    # Primary path: identity, no kernel launched.
    y = dummy_body_forward(x)
    jax.block_until_ready(y)
    assert y.shape == x.shape and y.dtype == x.dtype
    assert bool(jnp.all(y == x))

    # Explicit-copy path: single whole-ref HBM->HBM DMA.
    y_k = dummy_body_forward_pallas(x)
    jax.block_until_ready(y_k)
    assert y_k.shape == x.shape and y_k.dtype == x.dtype
    assert bool(jnp.all(y_k == x))

    # Chunked-DMA path (threshold lowered so the small test input exercises
    # the multi-chunk branch): 2 sublane-aligned chunks of 8 rows each.
    x_c = jax.random.normal(k2, (16, 128), dtype=jnp.float32)
    y_c = dummy_body_forward_pallas(x_c, max_chunks=2, chunk_threshold_bytes=0)
    jax.block_until_ready(y_c)
    assert bool(jnp.all(y_c == x_c))

    # Odd, non-tile-aligned shape: single whole-ref DMA (Mosaic handles the
    # padded layout); no masked vector stores are involved at all.
    x_odd = jax.random.normal(k3, (5, 7), dtype=jnp.float32)
    y_odd = dummy_body_forward_pallas(x_odd)
    jax.block_until_ready(y_odd)
    assert bool(jnp.all(y_odd == x_odd))

    print("KERNEL_OK")
</pallas_src>

<mosaic_0001>
module attributes {stable_mosaic.version = 11 : i64} {
  func.func @kernel(%arg0: memref<8x32xf32, #tpu.memory_space<any>>, %arg1: memref<8x32xf32, #tpu.memory_space<any>>, %arg2: memref<1x!tpu.dma_semaphore, #tpu.memory_space<semaphore_mem>>) attributes {dimension_semantics = [], scalar_prefetch = 0 : i64, scratch_operands = 1 : i64, tpu.core_type = #tpu.core_type<tc>} {
    %c0_i32 = arith.constant 0 : i32
    %0 = tpu.memref_slice %arg2[%c0_i32] : memref<1x!tpu.dma_semaphore, #tpu.memory_space<semaphore_mem>> -> memref<1x!tpu.dma_semaphore, #tpu.memory_space<semaphore_mem>>
    %1 = tpu.memref_squeeze %0 : memref<1x!tpu.dma_semaphore, #tpu.memory_space<semaphore_mem>> -> memref<!tpu.dma_semaphore, #tpu.memory_space<semaphore_mem>>
    tpu.enqueue_dma source(%arg0 : memref<8x32xf32, #tpu.memory_space<any>>) target(%arg1 : memref<8x32xf32, #tpu.memory_space<any>>) target_semaphore(%1 : memref<!tpu.dma_semaphore, #tpu.memory_space<semaphore_mem>>)
    %c0_i32_0 = arith.constant 0 : i32
    %2 = tpu.memref_slice %arg2[%c0_i32_0] : memref<1x!tpu.dma_semaphore, #tpu.memory_space<semaphore_mem>> -> memref<1x!tpu.dma_semaphore, #tpu.memory_space<semaphore_mem>>
    %3 = tpu.memref_squeeze %2 : memref<1x!tpu.dma_semaphore, #tpu.memory_space<semaphore_mem>> -> memref<!tpu.dma_semaphore, #tpu.memory_space<semaphore_mem>>
    tpu.wait_dma2 semaphore(%3 : memref<!tpu.dma_semaphore, #tpu.memory_space<semaphore_mem>>) src(%arg0 : memref<8x32xf32, #tpu.memory_space<any>>) dst(%arg1 : memref<8x32xf32, #tpu.memory_space<any>>)
    return
  }
}

</mosaic_0001>

<bundles_post_ra>
// kernel: tpu_custom_call.1
= control target key start
LH: loop header
LB: loop body
LE: loop exit
PB: predicated region body
PF: predicated region fallthrough
CT: control target
= control target key end

     0   :  { %s28_s6 = smov [#allocation2]   ;;  %s29_s7 = smov 131072   ;;  %s47_s0 = inlined_call_operand.hbm [shape: f32[8,32], index: 0, kind: input, shape index: {}]   ;;  %s48_s1 = inlined_call_operand.hbm [shape: f32[8,32], index: 1, kind: output, shape index: {}]  }
   0x1   :  { %s30_s8 = smov 0  }
   0x2   :  { %12 = dma.general %s47_s0, 128, %s48_s1, %s28_s6, %s29_s7, [#allocation4], %s30_s8, 0  }
   0x3   :  { %26 = dma.done.wait [#allocation2], 128 }
   0x4   :  { %27 = vsyncadd [#allocation2], 4294967168 }
   0x5   :  { %16 = vsyncmov [#allocation2] }
   0x8   :  { %s17_s13 = vpop.sfrf %16 }
   0x9   :  { %p22_p0 = scmp.ne.s32.totalorder %s17_s13, 0 }
   0xb   :  { %21 = shalt.err (%p22_p0)  }

</bundles_post_ra>
